<compile_context>
chip_gen: v7x
topology: tpu7x:2x2x1
jax: 0.10.0
libtpu: 0.0.40
codegen_flags: <defaults>
</compile_context>

<pallas_src>
import jax
import jax.numpy as jnp
from jax.experimental import pallas as pl
from jax.experimental.pallas import tpu as pltpu


def _round_up(x, m):
    return ((x + m - 1) // m) * m


def _discriminator_kernel(x_ref, w0_ref, b0_ref, w1_ref, b1_ref, o_ref):
    # Layer 0: Linear + LeakyReLU(0.2).  (tb, P) @ (P, H) on the MXU, f32 accumulate.
    h = jnp.dot(x_ref[...], w0_ref[...], preferred_element_type=jnp.float32)
    h = h + b0_ref[...].astype(jnp.float32)              # (tb, H) + (1, H)
    h = jnp.where(h >= 0.0, h, 0.2 * h)                  # LeakyReLU(0.2)
    # Layer 1: Linear(H, 1) + Sigmoid, computed as (1, H) x (H, tb) -> (1, tb) so the
    # result lives on lanes and the output store is lane-dense (no vst.msk columns).
    y = jax.lax.dot_general(
        w1_ref[...].astype(jnp.float32), h,
        dimension_numbers=(((1,), (1,)), ((), ())),
        preferred_element_type=jnp.float32)               # (1, tb)
    y = y + b1_ref[...].astype(jnp.float32)               # (1, tb) + (1, 1)
    o_ref[...] = (1.0 / (1.0 + jnp.exp(-y)))[None].astype(o_ref.dtype)


def discriminator_net(x, w0, b0, w1, b1, *, block_b=None):
    """Fused forward pass of DiscriminatorNet.

    x : (B, polymer_dim)            f32 or bf16
    w0: (polymer_dim, 128)  b0: (1, 128)
    w1: (1, 128)            b1: (1, 1)
    returns (B, 1) float32 probabilities.
    """
    B, P = x.shape
    H = w0.shape[1]
    assert w0.shape == (P, H) and b0.shape == (1, H)
    assert w1.shape == (1, H) and b1.shape == (1, 1)

    x_item = jnp.dtype(x.dtype).itemsize
    w_item = jnp.dtype(w0.dtype).itemsize

    TILE = 128  # lane multiple for the dense out row; also covers f32/bf16 sublanes.

    if block_b is None:
        # Size tb so the per-step x DMA is ~3 MiB (amortizes per-step overhead;
        # automatically larger for bf16 since itemsize halves).
        tb = (3 << 20) // max(1, P * x_item)
    else:
        tb = block_b
    # VMEM cap: x double-buffered + f32 hidden activations + out, per batch row.
    weight_bytes = 2 * (P * H + H) * w_item + 2 * (H + 1) * 4
    per_row_bytes = 2 * P * x_item + 2 * H * 4 + 2 * 4
    vmem_budget = 36 << 20                                # safe within v7x's 64 MiB
    tb = min(tb, max(TILE, (vmem_budget - weight_bytes) // per_row_bytes))
    # Keep >= 2 grid steps so both v7x TensorCores get batch tiles.
    tb = min(tb, _round_up(pl.cdiv(B, 2), TILE))
    tb = max(TILE, _round_up(tb, TILE))
    num_tiles = pl.cdiv(B, tb)

    vmem_need = weight_bytes + tb * per_row_bytes + (2 << 20)
    vmem_limit = int(min(max(vmem_need, 16 << 20), 60 << 20))

    flops = 2 * B * (P * H + H)
    bytes_accessed = (B * P * x_item + B * 4
                      + (P * H + H) * w_item + (H + 1) * 4)

    out = pl.pallas_call(
        _discriminator_kernel,
        out_shape=jax.ShapeDtypeStruct((num_tiles, 1, tb), jnp.float32),
        grid_spec=pltpu.PrefetchScalarGridSpec(
            num_scalar_prefetch=0,
            grid=(num_tiles,),
            in_specs=[
                pl.BlockSpec((tb, P), lambda i: (i, 0)),   # streamed per batch tile
                pl.BlockSpec((P, H), lambda i: (0, 0)),    # VMEM-resident weights
                pl.BlockSpec((1, H), lambda i: (0, 0)),    # VMEM-resident bias
                pl.BlockSpec((1, H), lambda i: (0, 0)),    # VMEM-resident weights
                pl.BlockSpec((1, 1), lambda i: (0, 0)),    # VMEM-resident bias
            ],
            out_specs=pl.BlockSpec((1, 1, tb), lambda i: (i, 0, 0)),  # lane-dense row
        ),
        compiler_params=pltpu.CompilerParams(
            dimension_semantics=("parallel",),             # shard batch tiles on v7x
            vmem_limit_bytes=vmem_limit,
        ),
        cost_estimate=pl.CostEstimate(
            flops=int(flops),
            transcendentals=int(B),                        # one exp per output row
            bytes_accessed=int(bytes_accessed),
        ),
    )(x, w0, b0, w1, b1)

    # (num_tiles, 1, tb) lane-dense layout -> (B, 1).  The tail rows of the last
    # (boundary) tile are unspecified and are sliced off here; do not feed them
    # into any downstream fused reduction.
    return out.reshape(num_tiles * tb)[:B].reshape(B, 1)


def init_params(key, polymer_dim, hidden=128):
    """Torch nn.Linear-style init (uniform +/- 1/sqrt(fan_in)), laid out for the kernel."""
    k0, k1, k2, k3 = jax.random.split(key, 4)
    lim0 = 1.0 / jnp.sqrt(jnp.float32(polymer_dim))
    lim1 = 1.0 / jnp.sqrt(jnp.float32(hidden))
    w0 = jax.random.uniform(k0, (polymer_dim, hidden), jnp.float32, -lim0, lim0)  # (in, out)
    b0 = jax.random.uniform(k1, (1, hidden), jnp.float32, -lim0, lim0)
    w1 = jax.random.uniform(k2, (1, hidden), jnp.float32, -lim1, lim1)            # (out, in)
    b1 = jax.random.uniform(k3, (1, 1), jnp.float32, -lim1, lim1)
    return w0, b0, w1, b1


if __name__ == "__main__":
    key = jax.random.PRNGKey(0)
    k_in, k_par = jax.random.split(key)

    batch = 512
    polymer_dim = 32
    hidden = 128

    x = jax.random.normal(k_in, (batch, polymer_dim), dtype=jnp.float32)
    w0, b0, w1, b1 = init_params(k_par, polymer_dim, hidden)

    # Pure-JAX reference (same math as torch: LeakyReLU(0.2) + sigmoid).
    def ref_fn(xs):
        h = xs @ w0 + b0
        h = jnp.where(h >= 0.0, h, 0.2 * h)
        y = h @ w1.T + b1
        return 1.0 / (1.0 + jnp.exp(-y))

    ref = ref_fn(x)

    # f32 path (matches the torch f32 model), auto tile size.
    out = jax.block_until_ready(discriminator_net(x, w0, b0, w1, b1))
    assert out.shape == (batch, 1)
    assert jnp.allclose(out, ref, atol=1e-4, rtol=1e-5)

    # Non-divisible batch: exercises the pad-free boundary block.
    out_b = jax.block_until_ready(discriminator_net(x[:500], w0, b0, w1, b1))
    assert out_b.shape == (500, 1)
    assert jnp.allclose(out_b, ref[:500], atol=1e-4, rtol=1e-5)

    # bf16 streaming path: halves HBM traffic on x / weights, f32 MXU accumulate
    # and f32 activations/sigmoid (v5e VPU/EUP have no bf16).
    out_bf16 = jax.block_until_ready(
        discriminator_net(x.astype(jnp.bfloat16),
                          w0.astype(jnp.bfloat16), b0,
                          w1.astype(jnp.bfloat16), b1))
    assert out_bf16.shape == (batch, 1)
    assert jnp.allclose(out_bf16, ref, atol=3e-2, rtol=0)

    print("KERNEL_OK")
</pallas_src>

<mosaic_0001>
module attributes {stable_mosaic.version = 11 : i64} {
  func.func @_discriminator_kernel(%arg0: i32, %arg1: memref<256x32xf32, #tpu.memory_space<vmem>>, %arg2: memref<32x128xf32, #tpu.memory_space<vmem>>, %arg3: memref<1x128xf32, #tpu.memory_space<vmem>>, %arg4: memref<1x128xf32, #tpu.memory_space<vmem>>, %arg5: memref<1x1xf32, #tpu.memory_space<vmem>>, %arg6: memref<1x1x256xf32, #tpu.memory_space<vmem>>) attributes {dimension_semantics = [#tpu.dimension_semantics<parallel>], iteration_bounds = array<i64: 2>, scalar_prefetch = 0 : i64, scratch_operands = 0 : i64, tpu.core_type = #tpu.core_type<tc>, window_params = [{transform_indices = @transform_0, window_bounds = array<i64: 256, 32>}, {pipeline_mode = #tpu.pipeline_mode<synchronous>, transform_indices = @transform_1, window_bounds = array<i64: 32, 128>}, {pipeline_mode = #tpu.pipeline_mode<synchronous>, transform_indices = @transform_2, window_bounds = array<i64: 1, 128>}, {pipeline_mode = #tpu.pipeline_mode<synchronous>, transform_indices = @transform_3, window_bounds = array<i64: 1, 128>}, {pipeline_mode = #tpu.pipeline_mode<synchronous>, transform_indices = @transform_4, window_bounds = array<i64: 1, 1>}, {transform_indices = @transform_5, window_bounds = array<i64: 1, 1, 256>}]} {
    %c0 = arith.constant 0 : index
    %c0_0 = arith.constant 0 : index
    %0 = vector.load %arg1[%c0, %c0_0] : memref<256x32xf32, #tpu.memory_space<vmem>>, vector<256x32xf32>
    %c0_1 = arith.constant 0 : index
    %c0_2 = arith.constant 0 : index
    %1 = vector.load %arg2[%c0_1, %c0_2] : memref<32x128xf32, #tpu.memory_space<vmem>>, vector<32x128xf32>
    %cst = arith.constant dense<0.000000e+00> : vector<256x128xf32>
    %2 = tpu.matmul %0, %1, %cst {dimension_numbers = #tpu.dot_dimension_numbers<[1], [0], [0], [1], [0, 0, 1, 1], [], []>} : vector<256x32xf32>, vector<32x128xf32>, vector<256x128xf32> -> vector<256x128xf32>
    %c0_3 = arith.constant 0 : index
    %c0_4 = arith.constant 0 : index
    %3 = vector.load %arg3[%c0_3, %c0_4] : memref<1x128xf32, #tpu.memory_space<vmem>>, vector<1x128xf32>
    %4 = vector.broadcast %3 : vector<1x128xf32> to vector<256x128xf32>
    %5 = arith.addf %2, %4 : vector<256x128xf32>
    %cst_5 = arith.constant 0.000000e+00 : f32
    %6 = vector.broadcast %cst_5 : f32 to vector<256x128xf32>
    %7 = arith.cmpf oge, %5, %6 : vector<256x128xf32>
    %cst_6 = arith.constant 2.000000e-01 : f32
    %8 = vector.broadcast %cst_6 : f32 to vector<256x128xf32>
    %9 = arith.mulf %8, %5 : vector<256x128xf32>
    %10 = arith.select %7, %5, %9 : vector<256x128xi1>, vector<256x128xf32>
    %c0_7 = arith.constant 0 : index
    %c0_8 = arith.constant 0 : index
    %11 = vector.load %arg4[%c0_7, %c0_8] : memref<1x128xf32, #tpu.memory_space<vmem>>, vector<1x128xf32>
    %cst_9 = arith.constant dense<0.000000e+00> : vector<1x256xf32>
    %12 = tpu.matmul %11, %10, %cst_9 {dimension_numbers = #tpu.dot_dimension_numbers<[1], [1], [0], [0], [0, 0, 1, 0], [], []>} : vector<1x128xf32>, vector<256x128xf32>, vector<1x256xf32> -> vector<1x256xf32>
    %c0_10 = arith.constant 0 : index
    %c0_11 = arith.constant 0 : index
    %13 = vector.load %arg5[%c0_10, %c0_11] : memref<1x1xf32, #tpu.memory_space<vmem>>, vector<1x1xf32>
    %14 = vector.broadcast %13 : vector<1x1xf32> to vector<1x256xf32>
    %15 = arith.addf %12, %14 : vector<1x256xf32>
    %cst_12 = arith.constant 0.000000e+00 : f32
    %16 = vector.broadcast %cst_12 : f32 to vector<1x256xf32>
    %17 = arith.subf %16, %15 : vector<1x256xf32>
    %18 = math.exp %17 : vector<1x256xf32>
    %cst_13 = arith.constant 1.000000e+00 : f32
    %19 = vector.broadcast %cst_13 : f32 to vector<1x256xf32>
    %20 = arith.addf %19, %18 : vector<1x256xf32>
    %cst_14 = arith.constant 1.000000e+00 : f32
    %21 = vector.broadcast %cst_14 : f32 to vector<1x256xf32>
    %22 = arith.divf %21, %20 : vector<1x256xf32>
    %23 = vector.shape_cast %22 : vector<1x256xf32> to vector<1x1x256xf32>
    %c0_15 = arith.constant 0 : index
    %c0_16 = arith.constant 0 : index
    %c0_17 = arith.constant 0 : index
    %24 = vector.load %arg6[%c0_15, %c0_16, %c0_17] : memref<1x1x256xf32, #tpu.memory_space<vmem>>, vector<1x1x256xf32>
    tpu.vector_store %arg6[%c0_15, %c0_16, %c0_17], %23 {strides = array<i32>} : memref<1x1x256xf32, #tpu.memory_space<vmem>>, vector<1x1x256xf32>,
    return
  }
  func.func @transform_0(%arg0: i32) -> (i32, i32) {
    %c0_i32 = arith.constant 0 : i32
    %c0_i32_0 = arith.constant 0 : i32
    return %arg0, %c0_i32 : i32, i32
  }
  func.func @transform_1(%arg0: i32) -> (i32, i32) {
    %c0_i32 = arith.constant 0 : i32
    %c0_i32_0 = arith.constant 0 : i32
    %c0_i32_1 = arith.constant 0 : i32
    return %c0_i32, %c0_i32_0 : i32, i32
  }
  func.func @transform_2(%arg0: i32) -> (i32, i32) {
    %c0_i32 = arith.constant 0 : i32
    %c0_i32_0 = arith.constant 0 : i32
    %c0_i32_1 = arith.constant 0 : i32
    return %c0_i32, %c0_i32_0 : i32, i32
  }
  func.func @transform_3(%arg0: i32) -> (i32, i32) {
    %c0_i32 = arith.constant 0 : i32
    %c0_i32_0 = arith.constant 0 : i32
    %c0_i32_1 = arith.constant 0 : i32
    return %c0_i32, %c0_i32_0 : i32, i32
  }
  func.func @transform_4(%arg0: i32) -> (i32, i32) {
    %c0_i32 = arith.constant 0 : i32
    %c0_i32_0 = arith.constant 0 : i32
    %c0_i32_1 = arith.constant 0 : i32
    return %c0_i32, %c0_i32_0 : i32, i32
  }
  func.func @transform_5(%arg0: i32) -> (i32, i32, i32) {
    %c0_i32 = arith.constant 0 : i32
    %c0_i32_0 = arith.constant 0 : i32
    %c0_i32_1 = arith.constant 0 : i32
    return %arg0, %c0_i32, %c0_i32_0 : i32, i32, i32
  }
}

</mosaic_0001>

<bundles_post_ra>
// kernel: tpu_custom_call.1
= control target key start
LH: loop header
LB: loop body
LE: loop exit
PB: predicated region body
PF: predicated region fallthrough
CT: control target
= control target key end

     0   :  { %s1534_s0 = inlined_call_operand.vmem [shape: f32[512,32], index: 0, kind: input, shape index: {}]   ;;  %s1535_s1 = inlined_call_operand.vmem [shape: f32[32,128], index: 1, kind: input, shape index: {}]   ;;  %s1536_s2 = inlined_call_operand.vmem [shape: f32[1,128], index: 2, kind: input, shape index: {}]   ;;  %s1537_s3 = inlined_call_operand.vmem [shape: f32[1,128], index: 3, kind: input, shape index: {}]   ;;  %s1538_s4 = inlined_call_operand.<no memory space> [shape: f32[1,1], index: 4, kind: input, shape index: {}]   ;;  %s1539_s5 = inlined_call_operand.hbm [shape: f32[2,1,256], index: 5, kind: output, shape index: {}]  }
   0x1   :  { %v10_v0 = vstv %s1538_s4 }
   0x2   :  { %11 = vst [vmem:[#allocation2] sm:$0x1] %v10_v0 }
   0x3   :  { %12 = vsyncpa [#allocation4], 0 }
   0x4   :  { %14 = vsyncpa [#allocation4 + $0x1], 0  ;;  %s1241_s20 = smov 0   ;;  %s1243_s21 = smov 0  }
   0x5   :  { %s1245_s22 = smov 0   ;;  %s1247_s23 = smov 0  }
   0x6 LB: > { %s878_s4 = sadd.s32 4294967295, %s1203_s23   ;;  %s879_s24 = sadd.s32 4294967294, %s1203_s23   ;;  %s1203_s23 = sphi %s1247_s23, %s1545_s23   ;;  %s1199_s22 = sphi %s1245_s22, %s1544_s22   ;;  %s1195_s21 = sphi %s1243_s21, %s1543_s21   ;;  %s1191_s20 = sphi %s1241_s20, %s1542_s20  }
   0x7   : > { %s1264_s25 = sadd.s32 1, %s1203_s23   ;;  %s137_s26 = sadd.s32 1, %s1199_s22 }
   0x8   : > { %s134_s27 = ssub.s32 %s1203_s23, %s1264_s25  ;;  %p147_p0 = scmp.ne.s32.totalorder %s1199_s22, %s1195_s21 }
   0x9   : > { %p135_p1 = scmp.eq.s32.totalorder %s134_s27, 0  ;;  %p148_p2 = scmp.eq.s32.totalorder %s878_s4, 1 }
   0xa   : > { %p153_p3 = scmp.ne.s32.totalorder %s1195_s21, %s1191_s20  ;;  %p154_p4 = scmp.eq.s32.totalorder %s879_s24, 1 }
   0xb   : > { %s1274_s28 = scalar_select %p135_p1, %s1199_s22, %s137_s26  }
   0xc   : > { %p1276_p5 = por %p148_p2, %p147_p0  ;;  %p1280_p6 = por %p154_p4, %p153_p3 }
   0xd   : > { %p882_p7 = scmp.ge.s32.totalorder %s1203_s23, 1  ;;  %p193_p8 = scmp.lt.s32.totalorder %s1203_s23, 3 }
   0xf   : > { %p194_p9 = pnand %p882_p7, %p193_p8 }
  0x10   : > { %v259_v1 = vld [vmem:[%s1535_s1] sm:$0xff] (!%p194_p9)  ;;  %v260_v2 = vld [vmem:[%s1535_s1 + $0x8] sm:$0xff] (!%p194_p9)  ;;  %v261_v3 = vld [vmem:[%s1535_s1 + $0x10] sm:$0xff] (!%p194_p9)  ;;  %s1295_s12 = sshll.u32 (!%p194_p9), %s878_s4, 5  ;;  %vm270_vm0 = vcmask (!%p194_p9), 261120   ;;  %v1205_v41 = vmov (!%p194_p9), 0  }
  0x11   : > { %197 = sbr.rel (%p194_p9) target bundleno = 609 (0x261), region = 40  ;;  %v1051_v4 = vpack.c.bf16 (!%p194_p9), %v260_v2, %v259_v1  ;;  %v262_v5 = vld [vmem:[%s1535_s1 + $0x18] sm:$0xff] (!%p194_p9)  ;;  %p222_p10 = scmp.lt.s32.totalorder (!%p194_p9), %s1295_s12, 63  ;;  %v1374_v39 = vld [vmem:[%s1537_s3] sm:$0x1] (!%p194_p9)  ;;  %1132 = vset.pattern.permute.xlu0 (!%p194_p9), %v1205_v41 }
  0x12   : > { %v1055_v6 = vpack.c.bf16 (!%p194_p9), %v262_v5, %v261_v3  ;;  %993 = vmatprep.mubr.f32.mxu1 (!%p194_p9), %v1374_v39  ;;  %v689_v40 = vld [vmem:[#allocation2] sm:$0x1] (!%p194_p9)  ;;  %s218_s6 = sand.u32 (!%p194_p9), 1, %s1195_s21   ;;  %s1492_s13 = scalar_lea.hbm (!%p194_p9), %s1539_s5, %s1295_s12 }
  0x13   : > { %1052 = vmatprep.subr.bf16.mxu0 (!%p194_p9), %v1051_v4  ;;  %692 = vperm.xlu0 (!%p194_p9), %1132, %v689_v40   ;;  %v1380_v42 = vld [vmem:[%s1536_s2] ss:$0 sm:$0xff] (!%p194_p9)  ;;  %s883_s7 = sshll.u32 (!%p194_p9), %s218_s6, 1  ;;  %s806_s14 = scalar_lea.sflag (!%p194_p9), [#allocation4], %s218_s6 }
  0x14   : > { %1054 = vmatpush3.bf16.msra.mxu0 (!%p194_p9), %v1051_v4  ;;  %s220_s8 = scalar_lea.vmem (!%p194_p9), [#allocation3], %s883_s7 }
  0x15   : > { %1056 = vmatprep.subr.bf16.mxu0 (!%p194_p9), %v1055_v6  ;;  %s820_s9 = sshll.u32 (!%p194_p9), %s220_s8, 4  ;;  %s1494_s9 = int_to_ptr.vmem [resolvable:$true] %s820_s9 }
  0x18   : > { %s223_s15 = scalar_select %p222_p10, %s1295_s12, 63  ;;  %1058 = vmatpush3.bf16.msra.mxu0 %v1055_v6 }
  0x1a   : > { %s885_s16 = sshll.u32 %s223_s15, 3  ;;  %s1141_s15 = scalar_lea.vmem %s1494_s9, 32 }
  0x1b   : > { %s1305_s19 = scalar_lea.vmem %s1534_s0, %s885_s16  ;;  %p1142_p11 = scmp.ne.s32.totalorder %s1494_s9, %s1141_s15 }
  0x1c   : > { %v227_v7 = vld [vmem:[%s1305_s19] sm:$0xff]  ;;  %v228_v8 = vld [vmem:[%s1305_s19 + $0x8] sm:$0xff]  ;;  %v229_v9 = vld [vmem:[%s1305_s19 + $0x10] sm:$0xff]  ;;  %s1207_s16 = smov [#allocation3]  }
  0x1d   : > { %1003 = vmatprep.mubr.msk.f32.mxu0 %vm270_vm0, %v227_v7  ;;  %v230_v10 = vld [vmem:[%s1305_s19 + $0x18] sm:$0xff]  ;;  %v231_v11 = vld [vmem:[%s1305_s19 + $0x20] sm:$0xff]  ;;  %v232_v12 = vld [vmem:[%s1305_s19 + $0x28] sm:$0xff]  ;;  %p1143_p12 = pnand %p1142_p11, %p1276_p5  ;;  %s1145_s17 = sshll.u32 %s1207_s16, 4  ;;  %s1146_s17 = int_to_ptr.vmem [resolvable:$false] %s1145_s17 }
  0x1e   : > { %1004 = vmatmul.mubr.msk.f32.vlgmr.msra.gmra.mrb[0].mxu0 %vm270_vm0, %v228_v8  ;;  %v233_v13 = vld [vmem:[%s1305_s19 + $0x30] sm:$0xff]  ;;  %v234_v14 = vld [vmem:[%s1305_s19 + $0x38] sm:$0xff]  ;;  %v235_v15 = vld [vmem:[%s1305_s19 + $0x40] sm:$0xff]  ;;  %s1147_s18 = scalar_lea.vmem %s1146_s17, 64  ;;  %p1148_p0 = scmp.lt.s32.totalorder %s1494_s9, %s1146_s17 }
  0x1f   : > { %1006 = vmatprep.mubr.msk.f32.mxu0 %vm270_vm0, %v229_v9  ;;  %v236_v16 = vld [vmem:[%s1305_s19 + $0x48] sm:$0xff]  ;;  %v237_v17 = vld [vmem:[%s1305_s19 + $0x50] sm:$0xff]  ;;  %v238_v18 = vld [vmem:[%s1305_s19 + $0x58] sm:$0xff]  ;;  %p1144_p13 = pneg %p1143_p12  ;;  %p1149_p1 = scmp.lt.s32.totalorder %s1147_s18, %s1141_s15 }
  0x20   : > { %v239_v19 = vld [vmem:[%s1305_s19 + $0x60] sm:$0xff]  ;;  %v240_v20 = vld [vmem:[%s1305_s19 + $0x68] sm:$0xff]  ;;  %v241_v21 = vld [vmem:[%s1305_s19 + $0x70] sm:$0xff] }
  0x21   : > { %v242_v22 = vld [vmem:[%s1305_s19 + $0x78] sm:$0xff]  ;;  %v243_v23 = vld [vmem:[%s1305_s19 + $0x80] sm:$0xff]  ;;  %v244_v24 = vld [vmem:[%s1305_s19 + $0x88] sm:$0xff]  ;;  %p1150_p2 = por %p1149_p1, %p1148_p0 }
  0x22   : > { %1007 = vmatmul.mubr.msk.f32.gmra.mrb[2].mxu0 %vm270_vm0, %v230_v10  ;;  %v245_v25 = vld [vmem:[%s1305_s19 + $0x90] sm:$0xff]  ;;  %v246_v26 = vld [vmem:[%s1305_s19 + $0x98] sm:$0xff]  ;;  %v247_v27 = vld [vmem:[%s1305_s19 + $0xa0] sm:$0xff] }
  0x23   : > { %1009 = vmatprep.mubr.msk.f32.mxu0 %vm270_vm0, %v231_v11  ;;  %v248_v28 = vld [vmem:[%s1305_s19 + $0xa8] sm:$0xff]  ;;  %v249_v29 = vld [vmem:[%s1305_s19 + $0xb0] sm:$0xff]  ;;  %v250_v30 = vld [vmem:[%s1305_s19 + $0xb8] sm:$0xff]  ;;  %p1151_p3 = pnand %p1150_p2, %p1144_p13 }
  0x24   : > { %v251_v31 = vld [vmem:[%s1305_s19 + $0xc0] sm:$0xff]  ;;  %v252_v32 = vld [vmem:[%s1305_s19 + $0xc8] sm:$0xff]  ;;  %v253_v33 = vld [vmem:[%s1305_s19 + $0xd0] sm:$0xff] }
  0x25   : > { %v254_v34 = vld [vmem:[%s1305_s19 + $0xd8] sm:$0xff]  ;;  %v255_v35 = vld [vmem:[%s1305_s19 + $0xe0] sm:$0xff]  ;;  %v256_v36 = vld [vmem:[%s1305_s19 + $0xe8] sm:$0xff] }
  0x26   : > { %1010 = vmatmul.mubr.msk.f32.gmra.mrb[4].mxu0 %vm270_vm0, %v232_v12  ;;  %v257_v37 = vld [vmem:[%s1305_s19 + $0xf0] sm:$0xff]  ;;  %v258_v38 = vld [vmem:[%s1305_s19 + $0xf8] sm:$0xff] }
  0x27   : > { %1012 = vmatprep.mubr.msk.f32.mxu0 %vm270_vm0, %v233_v13 }
  0x2a   : > { %1013 = vmatmul.mubr.msk.f32.gmra.mrb[6].mxu0 %vm270_vm0, %v234_v14 }
  0x2b   : > { %1015 = vmatprep.mubr.msk.f32.mxu0 %vm270_vm0, %v235_v15 }
  0x2e   : > { %1016 = vmatmul.mubr.msk.f32.gmra.mrb[8].mxu0 %vm270_vm0, %v236_v16 }
  0x2f   : > { %1018 = vmatprep.mubr.msk.f32.mxu0 %vm270_vm0, %v237_v17 }
  0x32   : > { %1019 = vmatmul.mubr.msk.f32.gmra.mrb[10].mxu0 %vm270_vm0, %v238_v18 }
  0x33   : > { %1021 = vmatprep.mubr.msk.f32.mxu0 %vm270_vm0, %v239_v19 }
  0x36   : > { %1022 = vmatmul.mubr.msk.f32.gmra.mrb[12].mxu0 %vm270_vm0, %v240_v20 }
  0x37   : > { %1024 = vmatprep.mubr.msk.f32.mxu0 %vm270_vm0, %v241_v21 }
  0x3a   : > { %1025 = vmatmul.mubr.msk.f32.gmra.mrb[14].mxu0 %vm270_vm0, %v242_v22 }
  0x3b   : > { %1027 = vmatprep.mubr.msk.f32.mxu0 %vm270_vm0, %v243_v23 }
  0x3e   : > { %1028 = vmatmul.mubr.msk.f32.gmra.mrb[16].mxu0 %vm270_vm0, %v244_v24 }
  0x3f   : > { %1030 = vmatprep.mubr.msk.f32.mxu0 %vm270_vm0, %v245_v25 }
  0x42   : > { %1031 = vmatmul.mubr.msk.f32.gmra.mrb[18].mxu0 %vm270_vm0, %v246_v26 }
  0x43   : > { %1033 = vmatprep.mubr.msk.f32.mxu0 %vm270_vm0, %v247_v27 }
  0x46   : > { %1034 = vmatmul.mubr.msk.f32.gmra.mrb[20].mxu0 %vm270_vm0, %v248_v28 }
  0x47   : > { %1036 = vmatprep.mubr.msk.f32.mxu0 %vm270_vm0, %v249_v29 }
  0x4a   : > { %1037 = vmatmul.mubr.msk.f32.gmra.mrb[22].mxu0 %vm270_vm0, %v250_v30 }
  0x4b   : > { %1039 = vmatprep.mubr.msk.f32.mxu0 %vm270_vm0, %v251_v31 }
  0x4e   : > { %1040 = vmatmul.mubr.msk.f32.gmra.mrb[24].mxu0 %vm270_vm0, %v252_v32 }
  0x4f   : > { %1042 = vmatprep.mubr.msk.f32.mxu0 %vm270_vm0, %v253_v33 }
  0x52   : > { %1043 = vmatmul.mubr.msk.f32.gmra.mrb[26].mxu0 %vm270_vm0, %v254_v34 }
  0x53   : > { %1045 = vmatprep.mubr.msk.f32.mxu0 %vm270_vm0, %v255_v35 }
  0x56   : > { %1046 = vmatmul.mubr.msk.f32.gmra.mrb[28].mxu0 %vm270_vm0, %v256_v36 }
  0x57   : > { %1048 = vmatprep.mubr.msk.f32.mxu0 %vm270_vm0, %v257_v37 }
  0x5a   : > { %1049 = vmatmul.mubr.msk.f32.gmra.mrb[30].mxu0 %vm270_vm0, %v258_v38 }
  0xf1   : > { %v1005_v43 = vpop.f32.mrb[0].mxu0 }
  0xf2   : > { %v439_v44 = vadd.f32 %v1005_v43, %v1380_v42  ;;  %v433_v45 = vpop.f32.mrb[1].mxu0 }
  0xf3   : > { %v434_v46 = vadd.f32 %v1380_v42, %v433_v45 }
  0xf4   : > { %v625_v47 = vmul.f32 0.2, %v439_v44  ;;  %vm593_vm1 = vcmp.ge.f32.partialorder %v439_v44, 0.0 }
  0xf5   : > { %v624_v48 = vmul.f32 0.2, %v434_v46  ;;  %v1008_v49 = vpop.f32.mrb[2].mxu0  ;;  %vm592_vm2 = vcmp.ge.f32.partialorder %v434_v46, 0.0 }
  0xf6   : > { %v449_v50 = vadd.f32 %v1008_v49, %v1380_v42  ;;  %v443_v51 = vpop.f32.mrb[3].mxu0  ;;  %v1385_v52 = vsel %vm593_vm1, %v439_v44, %v625_v47 }
  0xf7   : > { %v444_v53 = vadd.f32 %v1380_v42, %v443_v51  ;;  %v1388_v54 = vsel %vm592_vm2, %v434_v46, %v624_v48 }
  0xf8   : > { %vm595_vm3 = vcmp.ge.f32.partialorder %v449_v50, 0.0  ;;  %v627_v55 = vmul.f32 0.2, %v449_v50  ;;  %v1061_v56 = vpack.c.bf16 %v1385_v52, %v1388_v54 }
  0xf9   : > { %vm594_vm4 = vcmp.ge.f32.partialorder %v444_v53, 0.0  ;;  %v626_v57 = vmul.f32 0.2, %v444_v53  ;;  %v1011_v58 = vpop.f32.mrb[4].mxu0 }
  0xfa   : > { %v459_v59 = vadd.f32 %v1011_v58, %v1380_v42  ;;  %v453_v60 = vpop.f32.mrb[5].mxu0  ;;  %v1393_v61 = vsel %vm595_vm3, %v449_v50, %v627_v55 }
  0xfb   : > { %v454_v62 = vadd.f32 %v1380_v42, %v453_v60  ;;  %v1396_v63 = vsel %vm594_vm4, %v444_v53, %v626_v57 }
  0xfc   : > { %vm597_vm5 = vcmp.ge.f32.partialorder %v459_v59, 0.0  ;;  %v629_v0 = vmul.f32 0.2, %v459_v59  ;;  %v1065_v1 = vpack.c.bf16 %v1393_v61, %v1396_v63 }
  0xfd   : > { %vm596_vm6 = vcmp.ge.f32.partialorder %v454_v62, 0.0  ;;  %v628_v2 = vmul.f32 0.2, %v454_v62  ;;  %v1014_v3 = vpop.f32.mrb[6].mxu0 }
  0xfe   : > { %v469_v4 = vadd.f32 %v1014_v3, %v1380_v42  ;;  %v463_v5 = vpop.f32.mrb[7].mxu0  ;;  %v1401_v6 = vsel %vm597_vm5, %v459_v59, %v629_v0 }
  0xff   : > { %v464_v7 = vadd.f32 %v1380_v42, %v463_v5  ;;  %v1404_v8 = vsel %vm596_vm6, %v454_v62, %v628_v2 }
 0x100   : > { %vm599_vm7 = vcmp.ge.f32.partialorder %v469_v4, 0.0  ;;  %v631_v9 = vmul.f32 0.2, %v469_v4  ;;  %v1069_v10 = vpack.c.bf16 %v1401_v6, %v1404_v8 }
 0x101   : > { %vm598_vm8 = vcmp.ge.f32.partialorder %v464_v7, 0.0  ;;  %v630_v11 = vmul.f32 0.2, %v464_v7  ;;  %v1017_v12 = vpop.f32.mrb[8].mxu0 }
 0x102   : > { %v479_v13 = vadd.f32 %v1017_v12, %v1380_v42  ;;  %v473_v14 = vpop.f32.mrb[9].mxu0  ;;  %v1409_v15 = vsel %vm599_vm7, %v469_v4, %v631_v9 }
 0x103   : > { %v474_v16 = vadd.f32 %v1380_v42, %v473_v14  ;;  %v1412_v17 = vsel %vm598_vm8, %v464_v7, %v630_v11 }
 0x104   : > { %vm601_vm9 = vcmp.ge.f32.partialorder %v479_v13, 0.0  ;;  %v633_v18 = vmul.f32 0.2, %v479_v13  ;;  %v1073_v19 = vpack.c.bf16 %v1409_v15, %v1412_v17 }
 0x105   : > { %vm600_vm10 = vcmp.ge.f32.partialorder %v474_v16, 0.0  ;;  %v632_v20 = vmul.f32 0.2, %v474_v16  ;;  %v1020_v21 = vpop.f32.mrb[10].mxu0 }
 0x106   : > { %v489_v22 = vadd.f32 %v1020_v21, %v1380_v42  ;;  %v483_v23 = vpop.f32.mrb[11].mxu0  ;;  %v1417_v24 = vsel %vm601_vm9, %v479_v13, %v633_v18 }
 0x107   : > { %v484_v25 = vadd.f32 %v1380_v42, %v483_v23  ;;  %v1420_v26 = vsel %vm600_vm10, %v474_v16, %v632_v20 }
 0x108   : > { %vm603_vm11 = vcmp.ge.f32.partialorder %v489_v22, 0.0  ;;  %v635_v27 = vmul.f32 0.2, %v489_v22  ;;  %v1077_v28 = vpack.c.bf16 %v1417_v24, %v1420_v26 }
 0x109   : > { %vm602_vm12 = vcmp.ge.f32.partialorder %v484_v25, 0.0  ;;  %v634_v29 = vmul.f32 0.2, %v484_v25  ;;  %v1023_v30 = vpop.f32.mrb[12].mxu0 }
 0x10a   : > { %v499_v31 = vadd.f32 %v1023_v30, %v1380_v42  ;;  %v493_v32 = vpop.f32.mrb[13].mxu0  ;;  %v1425_v33 = vsel %vm603_vm11, %v489_v22, %v635_v27 }
 0x10b   : > { %v494_v34 = vadd.f32 %v1380_v42, %v493_v32  ;;  %v1428_v35 = vsel %vm602_vm12, %v484_v25, %v634_v29 }
 0x10c   : > { %vm605_vm13 = vcmp.ge.f32.partialorder %v499_v31, 0.0  ;;  %v637_v36 = vmul.f32 0.2, %v499_v31  ;;  %v1081_v37 = vpack.c.bf16 %v1425_v33, %v1428_v35 }
 0x10d   : > { %vm604_vm14 = vcmp.ge.f32.partialorder %v494_v34, 0.0  ;;  %v636_v38 = vmul.f32 0.2, %v494_v34  ;;  %v1026_v40 = vpop.f32.mrb[14].mxu0 }
 0x10e   : > { %v509_v41 = vadd.f32 %v1026_v40, %v1380_v42  ;;  %v503_v43 = vpop.f32.mrb[15].mxu0  ;;  %v1433_v44 = vsel %vm605_vm13, %v499_v31, %v637_v36 }
 0x10f   : > { %v504_v45 = vadd.f32 %v1380_v42, %v503_v43  ;;  %v1436_v46 = vsel %vm604_vm14, %v494_v34, %v636_v38 }
 0x110   : > { %vm607_vm15 = vcmp.ge.f32.partialorder %v509_v41, 0.0  ;;  %v639_v47 = vmul.f32 0.2, %v509_v41  ;;  %v1085_v48 = vpack.c.bf16 %v1433_v44, %v1436_v46 }
 0x111   : > { %vm606_vm0 = vcmp.ge.f32.partialorder %v504_v45, 0.0  ;;  %v638_v49 = vmul.f32 0.2, %v504_v45  ;;  %v1029_v50 = vpop.f32.mrb[16].mxu0 }
 0x112   : > { %v519_v51 = vadd.f32 %v1029_v50, %v1380_v42  ;;  %v513_v53 = vpop.f32.mrb[17].mxu0  ;;  %v1441_v55 = vsel %vm607_vm15, %v509_v41, %v639_v47 }
 0x113   : > { %v514_v57 = vadd.f32 %v1380_v42, %v513_v53  ;;  %v1444_v58 = vsel %vm606_vm0, %v504_v45, %v638_v49 }
 0x114   : > { %v641_v59 = vmul.f32 0.2, %v519_v51  ;;  %vm609_vm1 = vcmp.ge.f32.partialorder %v519_v51, 0.0  ;;  %v1089_v60 = vpack.c.bf16 %v1441_v55, %v1444_v58 }
 0x115   : > { %v640_v62 = vmul.f32 0.2, %v514_v57  ;;  %v1032_v0 = vpop.f32.mrb[18].mxu0  ;;  %vm608_vm2 = vcmp.ge.f32.partialorder %v514_v57, 0.0 }
 0x116   : > { %v529_v2 = vadd.f32 %v1032_v0, %v1380_v42  ;;  %v523_v3 = vpop.f32.mrb[19].mxu0  ;;  %v673_v4 = vsel %vm609_vm1, %v519_v51, %v641_v59 }
 0x117   : > { %v524_v5 = vadd.f32 %v1380_v42, %v523_v3  ;;  %v672_v7 = vsel %vm608_vm2, %v514_v57, %v640_v62 }
 0x118   : > { %vm611_vm3 = vcmp.ge.f32.partialorder %v529_v2, 0.0  ;;  %v643_v9 = vmul.f32 0.2, %v529_v2  ;;  %v1059_v11 = vpack.c.bf16 %v673_v4, %v672_v7 }
 0x119   : > { %vm610_vm4 = vcmp.ge.f32.partialorder %v524_v5, 0.0  ;;  %v642_v12 = vmul.f32 0.2, %v524_v5  ;;  %v1035_v13 = vpop.f32.mrb[20].mxu0 }
 0x11a   : > { %1060 = vmatprep.subr.bf16.mxu1 %v1059_v11  ;;  %v539_v14 = vadd.f32 %v1035_v13, %v1380_v42  ;;  %v533_v16 = vpop.f32.mrb[21].mxu0  ;;  %v675_v18 = vsel %vm611_vm3, %v529_v2, %v643_v9 }
 0x11b   : > { %1062 = vmatpush3.bf16.xpose.msra.mxu1 %v1061_v56  ;;  %v534_v20 = vadd.f32 %v1380_v42, %v533_v16  ;;  %v674_v21 = vsel %vm610_vm4, %v524_v5, %v642_v12 }
 0x11c   : > { %vm613_vm5 = vcmp.ge.f32.partialorder %v539_v14, 0.0  ;;  %v645_v22 = vmul.f32 0.2, %v539_v14  ;;  %v1063_v23 = vpack.c.bf16 %v675_v18, %v674_v21 }
 0x11d   : > { %vm612_vm6 = vcmp.ge.f32.partialorder %v534_v20, 0.0  ;;  %v644_v25 = vmul.f32 0.2, %v534_v20  ;;  %v1038_v27 = vpop.f32.mrb[22].mxu0 }
 0x11e   : > { %1064 = vmatprep.subr.bf16.mxu1 %v1063_v23  ;;  %v549_v29 = vadd.f32 %v1038_v27, %v1380_v42  ;;  %v543_v30 = vpop.f32.mrb[23].mxu0  ;;  %v677_v31 = vsel %vm613_vm5, %v539_v14, %v645_v22 }
 0x11f   : > { %v544_v32 = vadd.f32 %v1380_v42, %v543_v30  ;;  %v676_v34 = vsel %vm612_vm6, %v534_v20, %v644_v25 }
 0x120   : > { %vm615_vm7 = vcmp.ge.f32.partialorder %v549_v29, 0.0  ;;  %v647_v52 = vmul.f32 0.2, %v549_v29  ;;  %v1067_v54 = vpack.c.bf16 %v677_v31, %v676_v34 }
 0x121   : > { %vm614_vm8 = vcmp.ge.f32.partialorder %v544_v32, 0.0  ;;  %v646_v56 = vmul.f32 0.2, %v544_v32  ;;  %v1041_v36 = vpop.f32.mrb[24].mxu0 }
 0x122   : > { %v559_v38 = vadd.f32 %v1041_v36, %v1380_v42  ;;  %v553_v40 = vpop.f32.mrb[25].mxu0  ;;  %v679_v41 = vsel %vm615_vm7, %v549_v29, %v647_v52  ;;  %v1206_v29 = vmov 1966171168  }
 0x123   : > { %1066 = vmatpush3.bf16.xpose.msra.mxu1 %v1065_v1  ;;  %v554_v43 = vadd.f32 %v1380_v42, %v553_v40  ;;  %v678_v45 = vsel %vm614_vm8, %v544_v32, %v646_v56  ;;  %v786_v30 = vunpack.c.l.s4 %v1206_v29 }
 0x124   : > { %1068 = vmatprep.subr.bf16.mxu1 %v1067_v54  ;;  %vm617_vm9 = vcmp.ge.f32.partialorder %v559_v38, 0.0  ;;  %v649_v47 = vmul.f32 0.2, %v559_v38  ;;  %v1071_v49 = vpack.c.bf16 %v679_v41, %v678_v45 }
 0x125   : > { %vm616_vm10 = vcmp.ge.f32.partialorder %v554_v43, 0.0  ;;  %v648_v50 = vmul.f32 0.2, %v554_v43  ;;  %v1044_v51 = vpop.f32.mrb[26].mxu0  ;;  %v787_v31 = vunpack.c.0.s8 %v786_v30 }
 0x126   : > { %v569_v53 = vadd.f32 %v1044_v51, %v1380_v42  ;;  %v563_v57 = vpop.f32.mrb[27].mxu0  ;;  %v681_v59 = vsel %vm617_vm9, %v559_v38, %v649_v47 }
 0x127   : > { %v564_v62 = vadd.f32 %v1380_v42, %v563_v57  ;;  %v680_v0 = vsel %vm616_vm10, %v554_v43, %v648_v50 }
 0x128   : > { %vm619_vm11 = vcmp.ge.f32.partialorder %v569_v53, 0.0  ;;  %v651_v61 = vmul.f32 0.2, %v569_v53  ;;  %v1075_v63 = vpack.c.bf16 %v681_v59, %v680_v0 }
 0x129   : > { %vm618_vm12 = vcmp.ge.f32.partialorder %v564_v62, 0.0  ;;  %v650_v1 = vmul.f32 0.2, %v564_v62  ;;  %v1047_v2 = vpop.f32.mrb[28].mxu0 }
 0x12a   : > { %v579_v3 = vadd.f32 %v1047_v2, %v1380_v42  ;;  %v573_v4 = vpop.f32.mrb[29].mxu0  ;;  %v683_v5 = vsel %vm619_vm11, %v569_v53, %v651_v61 }
 0x12b   : > { %1070 = vmatpush3.bf16.xpose.msra.mxu1 %v1069_v10  ;;  %v574_v7 = vadd.f32 %v1380_v42, %v573_v4  ;;  %v682_v9 = vsel %vm618_vm12, %v564_v62, %v650_v1 }
 0x12c   : > { %1072 = vmatprep.subr.bf16.mxu1 %v1071_v49  ;;  %vm621_vm13 = vcmp.ge.f32.partialorder %v579_v3, 0.0  ;;  %v653_v11 = vmul.f32 0.2, %v579_v3  ;;  %v1079_v12 = vpack.c.bf16 %v683_v5, %v682_v9 }
 0x12d   : > { %vm620_vm14 = vcmp.ge.f32.partialorder %v574_v7, 0.0  ;;  %v652_v13 = vmul.f32 0.2, %v574_v7  ;;  %v1050_v14 = vpop.f32.mrb[30].mxu0 }
 0x12e   : > { %v589_v16 = vadd.f32 %v1050_v14, %v1380_v42  ;;  %v583_v18 = vpop.f32.mrb[31].mxu0  ;;  %v685_v20 = vsel %vm621_vm13, %v579_v3, %v653_v11 }
 0x12f   : > { %v584_v21 = vadd.f32 %v1380_v42, %v583_v18  ;;  %v684_v22 = vsel %vm620_vm14, %v574_v7, %v652_v13  ;;  %v695_v42 = vlaneseq }
 0x130   : > { %vm623_vm15 = vcmp.ge.f32.partialorder %v589_v16, 0.0  ;;  %v655_v6 = vmul.f32 0.2, %v589_v16  ;;  %v1083_v8 = vpack.c.bf16 %v685_v20, %v684_v22 }
 0x131   : > { %vm622_vm0 = vcmp.ge.f32.partialorder %v584_v21, 0.0  ;;  %v654_v10 = vmul.f32 0.2, %v584_v21  ;;  %v696_v15 = vshrl.u32 %v695_v42, 7  ;;  %vm802_vm1 = vcmp.lt.s32.totalorder %v695_v42, 256 }
 0x132   : > { %v687_v23 = vsel %vm623_vm15, %v589_v16, %v655_v6 }
 0x133   : > { %1074 = vmatpush3.bf16.xpose.msra.mxu1 %v1073_v19  ;;  %v686_v25 = vsel %vm622_vm0, %v584_v21, %v654_v10  ;;  %v697_v17 = vsub.s32 0, %v696_v15  ;;  %v693_v19 = vpop.permute.xlu0 %692  ;;  %v790_v34 = vsub.s32 %v787_v31, %v696_v15 }
 0x134   : > { %1076 = vmatprep.subr.bf16.mxu1 %v1075_v63  ;;  %v1087_v27 = vpack.c.bf16 %v687_v23, %v686_v25 }
 0x135   : > { %v698_v24 = vrot.slane %v693_v19, %v697_v17 }
 0x13b   : > { %1078 = vmatpush3.bf16.xpose.msra.mxu1 %v1077_v28 }
 0x13c   : > { %1080 = vmatprep.subr.bf16.mxu1 %v1079_v12 }
 0x143   : > { %1082 = vmatpush3.bf16.xpose.msra.mxu1 %v1081_v37 }
 0x144   : > { %1084 = vmatprep.subr.bf16.mxu1 %v1083_v8 }
 0x14b   : > { %1086 = vmatpush3.bf16.xpose.msra.mxu1 %v1085_v48 }
 0x14c   : > { %1088 = vmatprep.subr.bf16.mxu1 %v1087_v27 }
 0x153   : > { %1090 = vmatpush3.bf16.xpose.msra.mxu1 %v1089_v60 }
 0x15a   : > { %994 = vmatmul.mubr.f32.vlgmr.msra.gmra.mrb[0].mxu1 %v1374_v39 }
 0x22d   : > { %v765_v26 = vpop.f32.mrb[0].mxu1 }
 0x22e   : > { %v766_v28 = vadd.f32 %v765_v26, %v698_v24  ;;  %v767_v33 = vpop.f32.mrb[1].mxu1 }
 0x22f   : > { %v768_v35 = vadd.f32 %v767_v33, %v698_v24 }
 0x230   : > { %v770_v37 = vsub.f32 0.0, %v766_v28 }
 0x231   : > { %v771_v44 = vsub.f32 0.0, %v768_v35 }
 0x232   : > { %v772_v46 = vmul.f32 1.442695, %v770_v37 }
 0x233   : > { %v774_v48 = vmul.f32 1.442695, %v771_v44 }
 0x234   : > { %1133 = vpow2.f32 %v772_v46 }
 0x235   : > { %1135 = vpow2.f32 %v774_v48 }
 0x23e   : > { %v1134_v55 = vpop.eup %1133 }
 0x23f   : > { %v1136_v58 = vpop.eup %1135  ;;  %v776_v60 = vadd.f32 1.0, %v1134_v55 }
 0x240   : > { %v777_v39 = vadd.f32 1.0, %v1136_v58 }
 0x241   : > { %1137 = vrcp.f32 %v776_v60 }
 0x242   : > { %1139 = vrcp.f32 %v777_v39 }
 0x24b   : > { %v1138_v32 = vpop.eup %1137 }
 0x24c   : > { %v1140_v52 = vpop.eup %1139 }
 0x24d   : > { %v784_v54 = vcombine.low %v1138_v32, %v1140_v52 }
 0x24f   : > { %v791_v56 = vrot.slane %v784_v54, %v790_v34 }
 0x251   : > { %v798_v36 = vrot.slane %v791_v56, %v790_v34 }
 0x253   : > { %804 = vst.msk [vmem:[%s220_s8] sm:$0x3] %vm802_vm1, %v798_v36 }
 0x254   : > { %1154 = shalt.err (!%p1151_p3)
}
 0x255   : > { %s1155_s12 = scalar_lea.hbm %s1492_s13, 32  ;;  %s1159_s24 = scalar_lea.hbm %s1539_s5, 64 }
 0x256   : > { %p1156_p4 = scmp.ne.s32.totalorder %s1492_s13, %s1155_s12  ;;  %p1160_p9 = scmp.lt.u32.totalorder %s1492_s13, %s1539_s5 }
 0x257   : > { %p1161_p10 = scmp.lt.u32.totalorder %s1159_s24, %s1155_s12  ;;  %p1163_p12 = scmp.lt.u32.totalorder %s1155_s12, %s1492_s13 }
 0x258   : > { %p1157_p7 = pnand %p1156_p4, %p1276_p5 }
 0x259   : > { %p1162_p11 = por %p1161_p10, %p1160_p9 }
 0x25a   : > { %p1158_p8 = pneg %p1157_p7 }
 0x25b   : > { %p1164_p13 = por %p1163_p12, %p1162_p11 }
 0x25d   : > { %p1165_p0 = pnand %p1164_p13, %p1158_p8 }
 0x25f   : > { %1168 = shalt.err (!%p1165_p0)
}
 0x260   : > { %1091 = dma.vmem_to_hbm [thread:$0]  (%p1276_p5), %s1494_s9, 32, %s1492_s13, %s806_s14  }
 0x261 PF: > { %p1097_p1 = scmp.ge.s32.totalorder %s1203_s23, 2  ;;  %s832_s6 = sand.u32 1, %s1191_s20  }
 0x262   : > { %s833_s7 = scalar_lea.sflag [#allocation4], %s832_s6 }
 0x263   : > { %p1094_p2 = pnand %p1097_p1, %p1280_p6 }
 0x265   : > { %1186 = dma.done.wait (!%p1094_p2), %s833_s7, 32  }
 0x266   : > { %1188 = vsyncadd (!%p1094_p2), %s833_s7, 4294967264  ;;  %p17_p3 = scmp.ge.s32.totalorder %s1264_s25, 4   ;;  %s1542_s20 = smov %s1195_s21 }
 0x267   : > { %s1543_s21 = smov %s1199_s22  ;;  %s1544_s22 = smov %s1274_s28 }
 0x268   : > { %s1545_s23 = smov %s1264_s25  ;;  %19 = sbr.rel (!%p17_p3) target bundleno = 6 (0x6), region = 75 }
 0x26f   :  { %838 = vsyncpa [#allocation4], 1 }
 0x270   :  { %840 = vsyncpa [#allocation4 + $0x1], 1 }

</bundles_post_ra>
